<compile_context>
chip_gen: v7x
topology: tpu7x:2x2x1
jax: 0.10.0
libtpu: 0.0.40
codegen_flags: <defaults>
</compile_context>

<pallas_src>
import functools

import jax
import jax.numpy as jnp
from jax.experimental import pallas as pl
from jax.experimental.pallas import tpu as pltpu

_LANE = 128
_SUBLANE = 8
# Max rows-of-128 per grid step: 4096 rows -> 512K batch elems per step.
# Dense f32 footprint per step: x (2,4096,128)=4 MiB + out (4096,128)=2 MiB,
# ~12 MiB double-buffered -> well under the 32 MiB vmem limit set below on
# every generation (v5e/v6e 128 MiB physical, v7x 64 MiB physical).
_MAX_ROWS_PER_TILE = 4096
# Aim for at least this many grid steps so the pipeline can double-buffer and
# split across TensorCores before tiles hit the max size.
_TARGET_GRID_STEPS = 8


def _round_up(x, m):
    return (x + m - 1) // m * m


def _linear_sigmoid_kernel(wb_ref, x_ref, o_ref):
    # wb_ref: SMEM (3,) f32 = [w00, w01, bias]
    # x_ref : VMEM (2, R, 128) f32 -- feature-major, batch densely packed onto
    #         (sublane, lane) = (R, 128) vreg tiles.
    # o_ref : VMEM (R, 128) f32    -- dense, unmasked lane stores.
    w0 = wb_ref[0]
    w1 = wb_ref[1]
    b = wb_ref[2]
    # Degenerate K=2, Nout=1 contraction on the VPU: 2 vmul + 2 vadd.
    y = x_ref[0] * w0 + x_ref[1] * w1 + b
    # Numerically safe sigmoid: exp(-|y|) never overflows; the exp + divide
    # run on the otherwise-idle EUP, so the kernel stays DMA bound.
    e = jnp.exp(-jnp.abs(y))
    inv = 1.0 / (1.0 + e)
    o_ref[...] = jnp.where(y >= 0.0, inv, e * inv).astype(o_ref.dtype)


@functools.partial(jax.jit, static_argnames=("max_rows_per_tile",))
def linear_sigmoid(x, w, b, *, max_rows_per_tile=_MAX_ROWS_PER_TILE):
    """Pallas equivalent of sigmoid(torch.nn.Linear(2, 1)(x)).

    x: (N, 2) f32, w: (1, 2) f32, b: (1,) f32  ->  (N, 1) f32
    """
    n, k = x.shape
    assert k == 2 and w.shape == (1, 2) and b.shape == (1,)

    # Rows of 128 batch elements; pick a tile that gives >= _TARGET_GRID_STEPS
    # grid steps when possible, capped at max_rows_per_tile.
    n_rows = pl.cdiv(n, _LANE)
    tile_rows = min(
        max_rows_per_tile,
        max(_SUBLANE, _round_up(pl.cdiv(n_rows, _TARGET_GRID_STEPS), _SUBLANE)),
    )
    n_rows_pad = _round_up(n_rows, tile_rows)
    n_pad = n_rows_pad * _LANE

    # Feature-major, dense (8,128)-packable layout. Done under jit so the
    # transpose and the (modest) pad fuse into a single relayout pass.
    xt = jnp.pad(x.astype(jnp.float32).T, ((0, 0), (0, n_pad - n)))
    xt = xt.reshape(2, n_rows_pad, _LANE)

    # Weights + bias as three SMEM scalars.
    wb = jnp.concatenate([w.reshape(2), b.reshape(1)]).astype(jnp.float32)

    grid = (n_rows_pad // tile_rows,)
    out = pl.pallas_call(
        _linear_sigmoid_kernel,
        out_shape=jax.ShapeDtypeStruct((n_rows_pad, _LANE), jnp.float32),
        grid=grid,
        in_specs=[
            pl.BlockSpec(memory_space=pltpu.MemorySpace.SMEM),
            pl.BlockSpec((2, tile_rows, _LANE), lambda i: (0, i, 0)),
        ],
        out_specs=pl.BlockSpec((tile_rows, _LANE), lambda i: (i, 0)),
        compiler_params=pltpu.CompilerParams(
            dimension_semantics=("parallel",),
            vmem_limit_bytes=32 * 1024 * 1024,
        ),
    )(wb, xt)

    # Back to the PyTorch (N, 1) contract. The reshape is free; the slice only
    # costs a copy when n is not already a multiple of the tile.
    return out.reshape(-1)[:n].reshape(n, 1).astype(x.dtype)


if __name__ == "__main__":
    key = jax.random.PRNGKey(0)
    kx, kw, kb, kx2 = jax.random.split(key, 4)

    # torch.nn.Linear(2, 1): weight (1, 2), bias (1,)
    bound = 1.0 / jnp.sqrt(2.0)
    w = jax.random.uniform(kw, (1, 2), jnp.float32, minval=-bound, maxval=bound)
    b = jax.random.uniform(kb, (1,), jnp.float32, minval=-bound, maxval=bound)

    # Small batch of inputs with 2 features each (module expects (N, 2)).
    x = jax.random.normal(kx, (8, 2), jnp.float32)

    out = linear_sigmoid(x, w, b)
    jax.block_until_ready(out)

    ref = jax.nn.sigmoid(x @ w.T + b)
    assert out.shape == (8, 1)
    assert jnp.allclose(out, ref, atol=1e-5, rtol=1e-5), (out, ref)

    # Extra check exercising padding (3000 % 128 != 0) and a multi-step
    # "parallel" grid (small tile forces 3 grid steps).
    x2 = jax.random.normal(kx2, (3000, 2), jnp.float32)
    out2 = linear_sigmoid(x2, w, b, max_rows_per_tile=8)
    jax.block_until_ready(out2)
    ref2 = jax.nn.sigmoid(x2 @ w.T + b)
    assert out2.shape == (3000, 1)
    assert jnp.allclose(out2, ref2, atol=1e-5, rtol=1e-5)

    print("KERNEL_OK")
</pallas_src>

<mosaic_0001>
module attributes {stable_mosaic.version = 11 : i64} {
  func.func @_linear_sigmoid_kernel(%arg0: i32, %arg1: memref<3xf32, #tpu.memory_space<smem>>, %arg2: memref<2x8x128xf32, #tpu.memory_space<vmem>>, %arg3: memref<8x128xf32, #tpu.memory_space<vmem>>) attributes {dimension_semantics = [#tpu.dimension_semantics<parallel>], iteration_bounds = array<i64: 1>, scalar_prefetch = 0 : i64, scratch_operands = 0 : i64, tpu.core_type = #tpu.core_type<tc>, window_params = [{transform_indices = @transform_0, window_bounds = array<i64: 3>}, {transform_indices = @transform_1, window_bounds = array<i64: 2, 8, 128>}, {transform_indices = @transform_2, window_bounds = array<i64: 8, 128>}]} {
    %c0 = arith.constant 0 : index
    %0 = memref.load %arg1[%c0] : memref<3xf32, #tpu.memory_space<smem>>
    %c1 = arith.constant 1 : index
    %1 = memref.load %arg1[%c1] : memref<3xf32, #tpu.memory_space<smem>>
    %c2 = arith.constant 2 : index
    %2 = memref.load %arg1[%c2] : memref<3xf32, #tpu.memory_space<smem>>
    %c0_0 = arith.constant 0 : index
    %c0_1 = arith.constant 0 : index
    %c0_2 = arith.constant 0 : index
    %3 = vector.load %arg2[%c0_0, %c0_1, %c0_2] : memref<2x8x128xf32, #tpu.memory_space<vmem>>, vector<1x8x128xf32>
    %4 = vector.shape_cast %3 : vector<1x8x128xf32> to vector<8x128xf32>
    %5 = vector.broadcast %0 : f32 to vector<8x128xf32>
    %6 = arith.mulf %4, %5 : vector<8x128xf32>
    %c1_3 = arith.constant 1 : index
    %c0_4 = arith.constant 0 : index
    %c0_5 = arith.constant 0 : index
    %7 = vector.load %arg2[%c1_3, %c0_4, %c0_5] : memref<2x8x128xf32, #tpu.memory_space<vmem>>, vector<1x8x128xf32>
    %8 = vector.shape_cast %7 : vector<1x8x128xf32> to vector<8x128xf32>
    %9 = vector.broadcast %1 : f32 to vector<8x128xf32>
    %10 = arith.mulf %8, %9 : vector<8x128xf32>
    %11 = arith.addf %6, %10 : vector<8x128xf32>
    %12 = vector.broadcast %2 : f32 to vector<8x128xf32>
    %13 = arith.addf %11, %12 : vector<8x128xf32>
    %14 = math.absf %13 : vector<8x128xf32>
    %cst = arith.constant 0.000000e+00 : f32
    %15 = vector.broadcast %cst : f32 to vector<8x128xf32>
    %16 = arith.subf %15, %14 : vector<8x128xf32>
    %17 = math.exp %16 : vector<8x128xf32>
    %cst_6 = arith.constant 1.000000e+00 : f32
    %18 = vector.broadcast %cst_6 : f32 to vector<8x128xf32>
    %19 = arith.addf %18, %17 : vector<8x128xf32>
    %cst_7 = arith.constant 1.000000e+00 : f32
    %20 = vector.broadcast %cst_7 : f32 to vector<8x128xf32>
    %21 = arith.divf %20, %19 : vector<8x128xf32>
    %cst_8 = arith.constant 0.000000e+00 : f32
    %22 = vector.broadcast %cst_8 : f32 to vector<8x128xf32>
    %23 = arith.cmpf oge, %13, %22 : vector<8x128xf32>
    %24 = arith.mulf %17, %21 : vector<8x128xf32>
    %25 = arith.select %23, %21, %24 : vector<8x128xi1>, vector<8x128xf32>
    %c0_9 = arith.constant 0 : index
    %c0_10 = arith.constant 0 : index
    %26 = vector.load %arg3[%c0_9, %c0_10] : memref<8x128xf32, #tpu.memory_space<vmem>>, vector<8x128xf32>
    tpu.vector_store %arg3[%c0_9, %c0_10], %25 {strides = array<i32>} : memref<8x128xf32, #tpu.memory_space<vmem>>, vector<8x128xf32>,
    return
  }
  func.func @transform_0(%arg0: i32) -> i32 {
    %c0_i32 = arith.constant 0 : i32
    %c0_i32_0 = arith.constant 0 : i32
    return %c0_i32 : i32
  }
  func.func @transform_1(%arg0: i32) -> (i32, i32, i32) {
    %c0_i32 = arith.constant 0 : i32
    %c0_i32_0 = arith.constant 0 : i32
    %c0_i32_1 = arith.constant 0 : i32
    return %c0_i32, %arg0, %c0_i32_0 : i32, i32, i32
  }
  func.func @transform_2(%arg0: i32) -> (i32, i32) {
    %c0_i32 = arith.constant 0 : i32
    %c0_i32_0 = arith.constant 0 : i32
    return %arg0, %c0_i32 : i32, i32
  }
}

</mosaic_0001>

<bundles_post_ra>
// kernel: linear_sigmoid.1
= control target key start
LH: loop header
LB: loop body
LE: loop exit
PB: predicated region body
PF: predicated region fallthrough
CT: control target
= control target key end

     0   :  { %7 = vsyncpa [#allocation3], 0  ;;  %s103_s0 = inlined_call_operand.vmem [shape: f32[3], index: 0, kind: input, shape index: {}]   ;;  %s104_s1 = inlined_call_operand.vmem [shape: f32[2,8,128], index: 1, kind: input, shape index: {}]   ;;  %s105_s2 = inlined_call_operand.vmem [shape: f32[8,128], index: 2, kind: output, shape index: {}]  }
   0x1   :  { %s14_s11 = sshll.u32 %s103_s0, 4  ;;  %s15_s11 = int_to_ptr.vmem [resolvable:$true] %s14_s11 }
   0x2   :  { %s61_s12 = scalar_lea.vmem %s15_s11, 16  ;;  %p66_p1 = scmp.lt.s32.totalorder %s15_s11, %s15_s11 }
   0x3   :  { %p62_p0 = scmp.ne.s32.totalorder %s15_s11, %s61_s12  ;;  %p67_p2 = scmp.lt.s32.totalorder %s61_s12, %s61_s12 }
   0x5   :  { %p68_p3 = por %p67_p2, %p66_p1 }
   0x7   :  { %p69_p4 = pnand %p68_p3, %p62_p0 }
   0x9   :  { %72 = shalt.err (!%p69_p4)
}
   0xa   :  { %s75_s13 = smov [#allocation2]  }
   0xb   :  { %17 = dma.vmem_to_smem %s15_s11, 16, %s75_s13, [#allocation3]  }
   0xc   :  { %73 = dma.done.wait [#allocation3], 16  }
   0xd   :  { %74 = vsyncadd [#allocation3], 4294967280 }
   0xe   :  { %23 = sfence }
   0xf   :  { %s24_s14 = sld [smem:[#allocation2]]  ;;  %s53_s15 = sld [smem:[#allocation2 + $0x1]]  ;;  %v27_v0 = vld [vmem:[%s104_s1] sm:$0xff]  ;;  %v55_v1 = vld [vmem:[%s104_s1 + $0x8] sm:$0xff] }
  0x10   :  { %s54_s16 = sld [smem:[#allocation2 + $0x2]] }
  0x15   :  { %v28_v2 = vstv %s24_s14  ;;  %v32_v3 = vstv %s53_s15 }
  0x16   :  { %v29_v4 = vmul.f32 %v28_v2, %v27_v0  ;;  %v33_v5 = vmul.f32 %v55_v1, %v32_v3  ;;  %v35_v6 = vstv %s54_s16 }
  0x18   :  { %v34_v7 = vadd.f32 %v33_v5, %v29_v4 }
  0x1a   :  { %v36_v8 = vadd.f32 %v35_v6, %v34_v7 }
  0x1c   :  { %v37_v9 = vand.u32 2147483647, %v36_v8  ;;  %vm44_vm0 = vcmp.ge.f32.partialorder %v36_v8, 0.0 }
  0x1e   :  { %v38_v10 = vsub.f32 0.0, %v37_v9 }
  0x20   :  { %v39_v11 = vmul.f32 1.442695, %v38_v10 }
  0x22   :  { %57 = vpow2.f32 %v39_v11 }
  0x2c   :  { %v58_v12 = vpop.eup %57 }
  0x2d   :  { %v41_v13 = vadd.f32 1.0, %v58_v12 }
  0x2f   :  { %59 = vrcp.f32 %v41_v13 }
  0x39   :  { %v60_v14 = vpop.eup %59 }
  0x3a   :  { %v45_v15 = vmul.f32 %v60_v14, %v58_v12 }
  0x3c   :  { %v46_v16 = vsel %vm44_vm0, %v60_v14, %v45_v15 }
  0x3d   :  { %47 = vst [vmem:[%s105_s2] sm:$0xff] %v46_v16 }
  0x3e   :  { %52 = vsyncpa [#allocation3], 1 }

</bundles_post_ra>
